<compile_context>
chip_gen: v7x
topology: tpu7x:2x2x1
jax: 0.10.0
libtpu: 0.0.40
codegen_flags: <defaults>
</compile_context>

<pallas_src>
import functools
import math

import jax
import jax.numpy as jnp
from jax import lax
from jax.experimental import pallas as pl
from jax.experimental.pallas import tpu as pltpu


def _mha_kernel(q_ref, h_ref, wq_ref, wk_ref, wv_ref, wo_ref, o_ref, *,
                n_heads, key_dim, val_dim, norm_factor):
    # q_ref:  (b_tile, n_query,    input_dim)
    # h_ref:  (b_tile, graph_size, input_dim)
    # wq_ref/wk_ref: (input_dim, n_heads*key_dim)   (head-folded, head-major)
    # wv_ref:        (input_dim, n_heads*val_dim)
    # wo_ref:        (n_heads*val_dim, embed_dim)
    # o_ref:  (b_tile, n_query, embed_dim)
    b_tile, n_query, input_dim = q_ref.shape
    graph_size = h_ref.shape[1]
    embed_dim = wo_ref.shape[-1]

    # Flatten (batch, seq) into the sublane axis so the head-folded
    # projections run as single large 2-D MXU matmuls.
    q_flat = q_ref[...].reshape(b_tile * n_query, input_dim)
    h_flat = h_ref[...].reshape(b_tile * graph_size, input_dim)

    # Head-folded projections: one matmul each.  norm_factor is applied to Q
    # (rows x key_dim per head) rather than to the scores (rows x graph_size).
    q_proj = jnp.dot(q_flat, wq_ref[...],
                     preferred_element_type=jnp.float32) * norm_factor
    k_proj = jnp.dot(h_flat, wk_ref[...], preferred_element_type=jnp.float32)
    v_proj = jnp.dot(h_flat, wv_ref[...], preferred_element_type=jnp.float32)

    q_proj = q_proj.reshape(b_tile, n_query, n_heads * key_dim)
    k_proj = k_proj.reshape(b_tile, graph_size, n_heads * key_dim)
    v_proj = v_proj.reshape(b_tile, graph_size, n_heads * val_dim)

    # Per-head attention.  n_heads is a small static constant -> unrolled
    # Python loop; the batch axis stays batched inside the einsum.
    # TODO(synk): mask path (compatibility[mask] = -inf; attn[mask] = 0) is
    # not implemented; the module is exercised with mask=None.
    head_outs = []
    for hd in range(n_heads):
        q_h = q_proj[:, :, hd * key_dim:(hd + 1) * key_dim]
        k_h = k_proj[:, :, hd * key_dim:(hd + 1) * key_dim]
        v_h = v_proj[:, :, hd * val_dim:(hd + 1) * val_dim]

        # Contract key_dim on both operands -> no explicit K transpose.
        scores = jnp.einsum('bqk,bgk->bqg', q_h, k_h,
                            preferred_element_type=jnp.float32)

        # Numerically stable softmax, all in f32; reciprocal on the EUP slot.
        scores = scores - jnp.max(scores, axis=-1, keepdims=True)
        p = jnp.exp(scores)
        inv_l = pl.reciprocal(jnp.sum(p, axis=-1, keepdims=True), approx=True)
        attn = p * inv_l

        head_outs.append(jnp.einsum('bqg,bgv->bqv', attn, v_h,
                                    preferred_element_type=jnp.float32))

    # Concatenate heads along lanes (head-major, matching the PyTorch
    # W_out.view(n_heads*val_dim, embed_dim) layout) and apply the output
    # projection as a single folded matmul.
    heads = jnp.concatenate(head_outs, axis=-1)
    heads = heads.reshape(b_tile * n_query, n_heads * val_dim)
    out = jnp.dot(heads, wo_ref[...], preferred_element_type=jnp.float32)
    o_ref[...] = out.reshape(b_tile, n_query, embed_dim).astype(o_ref.dtype)


def _pick_batch_tile(B, n_query, graph_size, target_rows=256):
    """Largest divisor of B with b_tile*seq <= target_rows projection rows,
    keeping >= 2 grid steps when B >= 2 (megacore sharding on v7x)."""
    seq = max(n_query, graph_size, 1)
    desired = max(1, target_rows // seq)
    if B >= 2:
        desired = min(desired, max(1, B // 2))
    best = 1
    for d in range(1, B + 1):
        if B % d == 0 and d <= desired:
            best = d
    return best


def multi_head_attention(q, h, w_query, w_key, w_val, w_out, *,
                         compute_dtype=None):
    """q: (B, n_query, input_dim); h: (B, graph_size, input_dim) or None.

    w_query/w_key: (n_heads, input_dim, key_dim)
    w_val:         (n_heads, input_dim, val_dim)
    w_out:         (n_heads, val_dim,  embed_dim)
    compute_dtype: optional matmul-input dtype (e.g. jnp.bfloat16) for
                   production sizes; accumulation/softmax stay in f32.
    Returns (B, n_query, embed_dim) in q's original dtype.
    """
    if h is None:
        h = q
    B, n_query, input_dim = q.shape
    _, graph_size, _ = h.shape
    n_heads, _, key_dim = w_query.shape
    val_dim = w_val.shape[-1]
    embed_dim = w_out.shape[-1]
    norm_factor = 1.0 / math.sqrt(key_dim)
    out_dtype = q.dtype

    # Fold heads into the lane axis (head-major ordering).
    wq_f = jnp.transpose(w_query, (1, 0, 2)).reshape(input_dim, n_heads * key_dim)
    wk_f = jnp.transpose(w_key, (1, 0, 2)).reshape(input_dim, n_heads * key_dim)
    wv_f = jnp.transpose(w_val, (1, 0, 2)).reshape(input_dim, n_heads * val_dim)
    wo_f = w_out.reshape(n_heads * val_dim, embed_dim)

    if compute_dtype is not None:
        q = q.astype(compute_dtype)
        h = h.astype(compute_dtype)
        wq_f = wq_f.astype(compute_dtype)
        wk_f = wk_f.astype(compute_dtype)
        wv_f = wv_f.astype(compute_dtype)
        wo_f = wo_f.astype(compute_dtype)

    b_tile = _pick_batch_tile(B, n_query, graph_size)
    grid = (B // b_tile,)

    flops = 2 * B * (
        n_query * input_dim * n_heads * key_dim
        + graph_size * input_dim * n_heads * (key_dim + val_dim)
        + n_heads * n_query * graph_size * (key_dim + val_dim)
        + n_query * n_heads * val_dim * embed_dim)
    transcendentals = B * n_heads * n_query * graph_size
    bytes_accessed = int(
        q.size * q.dtype.itemsize + h.size * h.dtype.itemsize
        + wq_f.size * wq_f.dtype.itemsize + wk_f.size * wk_f.dtype.itemsize
        + wv_f.size * wv_f.dtype.itemsize + wo_f.size * wo_f.dtype.itemsize
        + B * n_query * embed_dim * jnp.dtype(out_dtype).itemsize)

    kernel = functools.partial(_mha_kernel, n_heads=n_heads, key_dim=key_dim,
                               val_dim=val_dim, norm_factor=norm_factor)

    return pl.pallas_call(
        kernel,
        out_shape=jax.ShapeDtypeStruct((B, n_query, embed_dim), out_dtype),
        grid_spec=pl.GridSpec(
            grid=grid,
            in_specs=[
                # Activation tiles: b_tile batch elements per grid step
                # (double-buffered HBM<->VMEM pipeline).
                pl.BlockSpec((b_tile, n_query, input_dim), lambda b: (b, 0, 0)),
                pl.BlockSpec((b_tile, graph_size, input_dim), lambda b: (b, 0, 0)),
                # Folded weights: constant block index -> fetched once,
                # resident in VMEM across all grid steps.
                pl.BlockSpec((input_dim, n_heads * key_dim), lambda b: (0, 0)),
                pl.BlockSpec((input_dim, n_heads * key_dim), lambda b: (0, 0)),
                pl.BlockSpec((input_dim, n_heads * val_dim), lambda b: (0, 0)),
                pl.BlockSpec((n_heads * val_dim, embed_dim), lambda b: (0, 0)),
            ],
            out_specs=pl.BlockSpec((b_tile, n_query, embed_dim),
                                   lambda b: (b, 0, 0)),
        ),
        compiler_params=pltpu.CompilerParams(
            dimension_semantics=("parallel",),
            vmem_limit_bytes=32 * 1024 * 1024,
        ),
        cost_estimate=pl.CostEstimate(flops=flops,
                                      transcendentals=transcendentals,
                                      bytes_accessed=bytes_accessed),
    )(q, h, wq_f, wk_f, wv_f, wo_f)


def _reference(q, h, w_query, w_key, w_val, w_out):
    # Pure-JAX reference of the PyTorch forward (mask=None), full f32 precision.
    hp = lax.Precision.HIGHEST
    norm = 1.0 / math.sqrt(w_query.shape[-1])
    Q = jnp.einsum('bqd,hdk->hbqk', q, w_query, precision=hp)
    K = jnp.einsum('bgd,hdk->hbgk', h, w_key, precision=hp)
    V = jnp.einsum('bgd,hdv->hbgv', h, w_val, precision=hp)
    compat = norm * jnp.einsum('hbqk,hbgk->hbqg', Q, K, precision=hp)
    attn = jax.nn.softmax(compat, axis=-1)
    heads = jnp.einsum('hbqg,hbgv->hbqv', attn, V, precision=hp)
    return jnp.einsum('hbqv,hve->bqe', heads, w_out, precision=hp)


if __name__ == "__main__":
    key = jax.random.PRNGKey(0)

    # Small shapes consistent with the module: batch=2, graph_size=8,
    # input_dim=hidden=32, n_heads=4, embed_dim=32 -> key_dim=val_dim=8.
    B, graph_size, input_dim = 2, 8, 32
    n_heads, embed_dim = 4, 32
    key_dim = val_dim = embed_dim // n_heads

    k_x, k_wq, k_wk, k_wv, k_wo = jax.random.split(key, 5)
    x = jax.random.normal(k_x, (B, graph_size, input_dim), dtype=jnp.float32)

    def init_w(k, shape):
        stdv = 1.0 / math.sqrt(shape[-1])
        return jax.random.uniform(k, shape, jnp.float32, minval=-stdv, maxval=stdv)

    w_query = init_w(k_wq, (n_heads, input_dim, key_dim))
    w_key = init_w(k_wk, (n_heads, input_dim, key_dim))
    w_val = init_w(k_wv, (n_heads, input_dim, val_dim))
    w_out = init_w(k_wo, (n_heads, val_dim, embed_dim))

    # Self-attention: h defaults to q.
    out = multi_head_attention(x, None, w_query, w_key, w_val, w_out)
    out = jax.block_until_ready(out)

    ref = _reference(x, x, w_query, w_key, w_val, w_out)
    assert out.shape == (B, graph_size, embed_dim)
    assert jnp.allclose(out, ref, atol=1e-2, rtol=1e-2)

    print("KERNEL_OK")
</pallas_src>

<mosaic_0001>
module attributes {stable_mosaic.version = 11 : i64} {
  func.func @_mha_kernel(%arg0: i32, %arg1: memref<1x8x32xf32, #tpu.memory_space<vmem>>, %arg2: memref<1x8x32xf32, #tpu.memory_space<vmem>>, %arg3: memref<32x32xf32, #tpu.memory_space<vmem>>, %arg4: memref<32x32xf32, #tpu.memory_space<vmem>>, %arg5: memref<32x32xf32, #tpu.memory_space<vmem>>, %arg6: memref<32x32xf32, #tpu.memory_space<vmem>>, %arg7: memref<1x8x32xf32, #tpu.memory_space<vmem>>) attributes {dimension_semantics = [#tpu.dimension_semantics<parallel>], iteration_bounds = array<i64: 2>, scalar_prefetch = 0 : i64, scratch_operands = 0 : i64, tpu.core_type = #tpu.core_type<tc>, window_params = [{transform_indices = @transform_0, window_bounds = array<i64: 1, 8, 32>}, {transform_indices = @transform_1, window_bounds = array<i64: 1, 8, 32>}, {pipeline_mode = #tpu.pipeline_mode<synchronous>, transform_indices = @transform_2, window_bounds = array<i64: 32, 32>}, {pipeline_mode = #tpu.pipeline_mode<synchronous>, transform_indices = @transform_3, window_bounds = array<i64: 32, 32>}, {pipeline_mode = #tpu.pipeline_mode<synchronous>, transform_indices = @transform_4, window_bounds = array<i64: 32, 32>}, {pipeline_mode = #tpu.pipeline_mode<synchronous>, transform_indices = @transform_5, window_bounds = array<i64: 32, 32>}, {transform_indices = @transform_6, window_bounds = array<i64: 1, 8, 32>}]} {
    %c0 = arith.constant 0 : index
    %c0_0 = arith.constant 0 : index
    %c0_1 = arith.constant 0 : index
    %0 = vector.load %arg1[%c0, %c0_0, %c0_1] : memref<1x8x32xf32, #tpu.memory_space<vmem>>, vector<1x8x32xf32>
    %1 = vector.shape_cast %0 : vector<1x8x32xf32> to vector<8x32xf32>
    %c0_2 = arith.constant 0 : index
    %c0_3 = arith.constant 0 : index
    %c0_4 = arith.constant 0 : index
    %2 = vector.load %arg2[%c0_2, %c0_3, %c0_4] : memref<1x8x32xf32, #tpu.memory_space<vmem>>, vector<1x8x32xf32>
    %3 = vector.shape_cast %2 : vector<1x8x32xf32> to vector<8x32xf32>
    %c0_5 = arith.constant 0 : index
    %c0_6 = arith.constant 0 : index
    %4 = vector.load %arg3[%c0_5, %c0_6] : memref<32x32xf32, #tpu.memory_space<vmem>>, vector<32x32xf32>
    %cst = arith.constant dense<0.000000e+00> : vector<8x32xf32>
    %5 = tpu.matmul %1, %4, %cst {dimension_numbers = #tpu.dot_dimension_numbers<[1], [0], [0], [1], [0, 0, 1, 1], [], []>} : vector<8x32xf32>, vector<32x32xf32>, vector<8x32xf32> -> vector<8x32xf32>
    %cst_7 = arith.constant 0.353553385 : f32
    %6 = vector.broadcast %cst_7 : f32 to vector<8x32xf32>
    %7 = arith.mulf %5, %6 : vector<8x32xf32>
    %c0_8 = arith.constant 0 : index
    %c0_9 = arith.constant 0 : index
    %8 = vector.load %arg4[%c0_8, %c0_9] : memref<32x32xf32, #tpu.memory_space<vmem>>, vector<32x32xf32>
    %cst_10 = arith.constant dense<0.000000e+00> : vector<8x32xf32>
    %9 = tpu.matmul %3, %8, %cst_10 {dimension_numbers = #tpu.dot_dimension_numbers<[1], [0], [0], [1], [0, 0, 1, 1], [], []>} : vector<8x32xf32>, vector<32x32xf32>, vector<8x32xf32> -> vector<8x32xf32>
    %c0_11 = arith.constant 0 : index
    %c0_12 = arith.constant 0 : index
    %10 = vector.load %arg5[%c0_11, %c0_12] : memref<32x32xf32, #tpu.memory_space<vmem>>, vector<32x32xf32>
    %cst_13 = arith.constant dense<0.000000e+00> : vector<8x32xf32>
    %11 = tpu.matmul %3, %10, %cst_13 {dimension_numbers = #tpu.dot_dimension_numbers<[1], [0], [0], [1], [0, 0, 1, 1], [], []>} : vector<8x32xf32>, vector<32x32xf32>, vector<8x32xf32> -> vector<8x32xf32>
    %12 = vector.shape_cast %7 : vector<8x32xf32> to vector<1x8x32xf32>
    %13 = vector.shape_cast %9 : vector<8x32xf32> to vector<1x8x32xf32>
    %14 = vector.shape_cast %11 : vector<8x32xf32> to vector<1x8x32xf32>
    %15 = vector.extract_strided_slice %12 {offsets = [0, 0, 0], sizes = [1, 8, 8], strides = [1, 1, 1]} : vector<1x8x32xf32> to vector<1x8x8xf32>
    %16 = vector.extract_strided_slice %13 {offsets = [0, 0, 0], sizes = [1, 8, 8], strides = [1, 1, 1]} : vector<1x8x32xf32> to vector<1x8x8xf32>
    %17 = vector.extract_strided_slice %14 {offsets = [0, 0, 0], sizes = [1, 8, 8], strides = [1, 1, 1]} : vector<1x8x32xf32> to vector<1x8x8xf32>
    "tpu.trace_start"() <{level = 10 : i32, message = "bqk,bgk->bqg"}> : () -> ()
    %cst_14 = arith.constant dense<0.000000e+00> : vector<1x8x8xf32>
    %18 = tpu.matmul %15, %16, %cst_14 {dimension_numbers = #tpu.dot_dimension_numbers<[2], [2], [1], [1], [0, 0, 0, 1, 1, 1], [0], [0]>} : vector<1x8x8xf32>, vector<1x8x8xf32>, vector<1x8x8xf32> -> vector<1x8x8xf32>
    "tpu.trace_stop"() : () -> ()
    %cst_15 = arith.constant dense<0xFF800000> : vector<1x8xf32>
    %19 = vector.multi_reduction <maximumf>, %18, %cst_15 [2] : vector<1x8x8xf32> to vector<1x8xf32>
    %20 = vector.shape_cast %19 : vector<1x8xf32> to vector<1x8x1xf32>
    %21 = vector.broadcast %20 : vector<1x8x1xf32> to vector<1x8x8xf32>
    %22 = arith.subf %18, %21 : vector<1x8x8xf32>
    %23 = math.exp %22 : vector<1x8x8xf32>
    %cst_16 = arith.constant dense<0.000000e+00> : vector<1x8xf32>
    %24 = vector.multi_reduction <add>, %23, %cst_16 [2] : vector<1x8x8xf32> to vector<1x8xf32>
    %25 = vector.shape_cast %24 : vector<1x8xf32> to vector<1x8x1xf32>
    %26 = tpu.reciprocal %25 {approx = true} : vector<1x8x1xf32> -> vector<1x8x1xf32>
    %27 = vector.broadcast %26 : vector<1x8x1xf32> to vector<1x8x8xf32>
    %28 = arith.mulf %23, %27 : vector<1x8x8xf32>
    "tpu.trace_start"() <{level = 10 : i32, message = "bqg,bgv->bqv"}> : () -> ()
    %cst_17 = arith.constant dense<0.000000e+00> : vector<1x8x8xf32>
    %29 = tpu.matmul %28, %17, %cst_17 {dimension_numbers = #tpu.dot_dimension_numbers<[2], [1], [1], [2], [0, 0, 0, 1, 1, 2], [0], [0]>} : vector<1x8x8xf32>, vector<1x8x8xf32>, vector<1x8x8xf32> -> vector<1x8x8xf32>
    "tpu.trace_stop"() : () -> ()
    %30 = vector.extract_strided_slice %12 {offsets = [0, 0, 8], sizes = [1, 8, 8], strides = [1, 1, 1]} : vector<1x8x32xf32> to vector<1x8x8xf32>
    %31 = vector.extract_strided_slice %13 {offsets = [0, 0, 8], sizes = [1, 8, 8], strides = [1, 1, 1]} : vector<1x8x32xf32> to vector<1x8x8xf32>
    %32 = vector.extract_strided_slice %14 {offsets = [0, 0, 8], sizes = [1, 8, 8], strides = [1, 1, 1]} : vector<1x8x32xf32> to vector<1x8x8xf32>
    "tpu.trace_start"() <{level = 10 : i32, message = "bqk,bgk->bqg"}> : () -> ()
    %cst_18 = arith.constant dense<0.000000e+00> : vector<1x8x8xf32>
    %33 = tpu.matmul %30, %31, %cst_18 {dimension_numbers = #tpu.dot_dimension_numbers<[2], [2], [1], [1], [0, 0, 0, 1, 1, 1], [0], [0]>} : vector<1x8x8xf32>, vector<1x8x8xf32>, vector<1x8x8xf32> -> vector<1x8x8xf32>
    "tpu.trace_stop"() : () -> ()
    %cst_19 = arith.constant dense<0xFF800000> : vector<1x8xf32>
    %34 = vector.multi_reduction <maximumf>, %33, %cst_19 [2] : vector<1x8x8xf32> to vector<1x8xf32>
    %35 = vector.shape_cast %34 : vector<1x8xf32> to vector<1x8x1xf32>
    %36 = vector.broadcast %35 : vector<1x8x1xf32> to vector<1x8x8xf32>
    %37 = arith.subf %33, %36 : vector<1x8x8xf32>
    %38 = math.exp %37 : vector<1x8x8xf32>
    %cst_20 = arith.constant dense<0.000000e+00> : vector<1x8xf32>
    %39 = vector.multi_reduction <add>, %38, %cst_20 [2] : vector<1x8x8xf32> to vector<1x8xf32>
    %40 = vector.shape_cast %39 : vector<1x8xf32> to vector<1x8x1xf32>
    %41 = tpu.reciprocal %40 {approx = true} : vector<1x8x1xf32> -> vector<1x8x1xf32>
    %42 = vector.broadcast %41 : vector<1x8x1xf32> to vector<1x8x8xf32>
    %43 = arith.mulf %38, %42 : vector<1x8x8xf32>
    "tpu.trace_start"() <{level = 10 : i32, message = "bqg,bgv->bqv"}> : () -> ()
    %cst_21 = arith.constant dense<0.000000e+00> : vector<1x8x8xf32>
    %44 = tpu.matmul %43, %32, %cst_21 {dimension_numbers = #tpu.dot_dimension_numbers<[2], [1], [1], [2], [0, 0, 0, 1, 1, 2], [0], [0]>} : vector<1x8x8xf32>, vector<1x8x8xf32>, vector<1x8x8xf32> -> vector<1x8x8xf32>
    "tpu.trace_stop"() : () -> ()
    %45 = vector.extract_strided_slice %12 {offsets = [0, 0, 16], sizes = [1, 8, 8], strides = [1, 1, 1]} : vector<1x8x32xf32> to vector<1x8x8xf32>
    %46 = vector.extract_strided_slice %13 {offsets = [0, 0, 16], sizes = [1, 8, 8], strides = [1, 1, 1]} : vector<1x8x32xf32> to vector<1x8x8xf32>
    %47 = vector.extract_strided_slice %14 {offsets = [0, 0, 16], sizes = [1, 8, 8], strides = [1, 1, 1]} : vector<1x8x32xf32> to vector<1x8x8xf32>
    "tpu.trace_start"() <{level = 10 : i32, message = "bqk,bgk->bqg"}> : () -> ()
    %cst_22 = arith.constant dense<0.000000e+00> : vector<1x8x8xf32>
    %48 = tpu.matmul %45, %46, %cst_22 {dimension_numbers = #tpu.dot_dimension_numbers<[2], [2], [1], [1], [0, 0, 0, 1, 1, 1], [0], [0]>} : vector<1x8x8xf32>, vector<1x8x8xf32>, vector<1x8x8xf32> -> vector<1x8x8xf32>
    "tpu.trace_stop"() : () -> ()
    %cst_23 = arith.constant dense<0xFF800000> : vector<1x8xf32>
    %49 = vector.multi_reduction <maximumf>, %48, %cst_23 [2] : vector<1x8x8xf32> to vector<1x8xf32>
    %50 = vector.shape_cast %49 : vector<1x8xf32> to vector<1x8x1xf32>
    %51 = vector.broadcast %50 : vector<1x8x1xf32> to vector<1x8x8xf32>
    %52 = arith.subf %48, %51 : vector<1x8x8xf32>
    %53 = math.exp %52 : vector<1x8x8xf32>
    %cst_24 = arith.constant dense<0.000000e+00> : vector<1x8xf32>
    %54 = vector.multi_reduction <add>, %53, %cst_24 [2] : vector<1x8x8xf32> to vector<1x8xf32>
    %55 = vector.shape_cast %54 : vector<1x8xf32> to vector<1x8x1xf32>
    %56 = tpu.reciprocal %55 {approx = true} : vector<1x8x1xf32> -> vector<1x8x1xf32>
    %57 = vector.broadcast %56 : vector<1x8x1xf32> to vector<1x8x8xf32>
    %58 = arith.mulf %53, %57 : vector<1x8x8xf32>
    "tpu.trace_start"() <{level = 10 : i32, message = "bqg,bgv->bqv"}> : () -> ()
    %cst_25 = arith.constant dense<0.000000e+00> : vector<1x8x8xf32>
    %59 = tpu.matmul %58, %47, %cst_25 {dimension_numbers = #tpu.dot_dimension_numbers<[2], [1], [1], [2], [0, 0, 0, 1, 1, 2], [0], [0]>} : vector<1x8x8xf32>, vector<1x8x8xf32>, vector<1x8x8xf32> -> vector<1x8x8xf32>
    "tpu.trace_stop"() : () -> ()
    %60 = vector.extract_strided_slice %12 {offsets = [0, 0, 24], sizes = [1, 8, 8], strides = [1, 1, 1]} : vector<1x8x32xf32> to vector<1x8x8xf32>
    %61 = vector.extract_strided_slice %13 {offsets = [0, 0, 24], sizes = [1, 8, 8], strides = [1, 1, 1]} : vector<1x8x32xf32> to vector<1x8x8xf32>
    %62 = vector.extract_strided_slice %14 {offsets = [0, 0, 24], sizes = [1, 8, 8], strides = [1, 1, 1]} : vector<1x8x32xf32> to vector<1x8x8xf32>
    "tpu.trace_start"() <{level = 10 : i32, message = "bqk,bgk->bqg"}> : () -> ()
    %cst_26 = arith.constant dense<0.000000e+00> : vector<1x8x8xf32>
    %63 = tpu.matmul %60, %61, %cst_26 {dimension_numbers = #tpu.dot_dimension_numbers<[2], [2], [1], [1], [0, 0, 0, 1, 1, 1], [0], [0]>} : vector<1x8x8xf32>, vector<1x8x8xf32>, vector<1x8x8xf32> -> vector<1x8x8xf32>
    "tpu.trace_stop"() : () -> ()
    %cst_27 = arith.constant dense<0xFF800000> : vector<1x8xf32>
    %64 = vector.multi_reduction <maximumf>, %63, %cst_27 [2] : vector<1x8x8xf32> to vector<1x8xf32>
    %65 = vector.shape_cast %64 : vector<1x8xf32> to vector<1x8x1xf32>
    %66 = vector.broadcast %65 : vector<1x8x1xf32> to vector<1x8x8xf32>
    %67 = arith.subf %63, %66 : vector<1x8x8xf32>
    %68 = math.exp %67 : vector<1x8x8xf32>
    %cst_28 = arith.constant dense<0.000000e+00> : vector<1x8xf32>
    %69 = vector.multi_reduction <add>, %68, %cst_28 [2] : vector<1x8x8xf32> to vector<1x8xf32>
    %70 = vector.shape_cast %69 : vector<1x8xf32> to vector<1x8x1xf32>
    %71 = tpu.reciprocal %70 {approx = true} : vector<1x8x1xf32> -> vector<1x8x1xf32>
    %72 = vector.broadcast %71 : vector<1x8x1xf32> to vector<1x8x8xf32>
    %73 = arith.mulf %68, %72 : vector<1x8x8xf32>
    "tpu.trace_start"() <{level = 10 : i32, message = "bqg,bgv->bqv"}> : () -> ()
    %cst_29 = arith.constant dense<0.000000e+00> : vector<1x8x8xf32>
    %74 = tpu.matmul %73, %62, %cst_29 {dimension_numbers = #tpu.dot_dimension_numbers<[2], [1], [1], [2], [0, 0, 0, 1, 1, 2], [0], [0]>} : vector<1x8x8xf32>, vector<1x8x8xf32>, vector<1x8x8xf32> -> vector<1x8x8xf32>
    "tpu.trace_stop"() : () -> ()
    %75 = tpu.concatenate %29, %44, %59, %74 in 2 : vector<1x8x8xf32>, vector<1x8x8xf32>, vector<1x8x8xf32>, vector<1x8x8xf32> -> vector<1x8x32xf32>
    %76 = vector.shape_cast %75 : vector<1x8x32xf32> to vector<8x32xf32>
    %c0_30 = arith.constant 0 : index
    %c0_31 = arith.constant 0 : index
    %77 = vector.load %arg6[%c0_30, %c0_31] : memref<32x32xf32, #tpu.memory_space<vmem>>, vector<32x32xf32>
    %cst_32 = arith.constant dense<0.000000e+00> : vector<8x32xf32>
    %78 = tpu.matmul %76, %77, %cst_32 {dimension_numbers = #tpu.dot_dimension_numbers<[1], [0], [0], [1], [0, 0, 1, 1], [], []>} : vector<8x32xf32>, vector<32x32xf32>, vector<8x32xf32> -> vector<8x32xf32>
    %79 = vector.shape_cast %78 : vector<8x32xf32> to vector<1x8x32xf32>
    %c0_33 = arith.constant 0 : index
    %c0_34 = arith.constant 0 : index
    %c0_35 = arith.constant 0 : index
    %80 = vector.load %arg7[%c0_33, %c0_34, %c0_35] : memref<1x8x32xf32, #tpu.memory_space<vmem>>, vector<1x8x32xf32>
    tpu.vector_store %arg7[%c0_33, %c0_34, %c0_35], %79 {strides = array<i32>} : memref<1x8x32xf32, #tpu.memory_space<vmem>>, vector<1x8x32xf32>,
    return
  }
  func.func @transform_0(%arg0: i32) -> (i32, i32, i32) {
    %c0_i32 = arith.constant 0 : i32
    %c0_i32_0 = arith.constant 0 : i32
    %c0_i32_1 = arith.constant 0 : i32
    return %arg0, %c0_i32, %c0_i32_0 : i32, i32, i32
  }
  func.func @transform_1(%arg0: i32) -> (i32, i32, i32) {
    %c0_i32 = arith.constant 0 : i32
    %c0_i32_0 = arith.constant 0 : i32
    %c0_i32_1 = arith.constant 0 : i32
    return %arg0, %c0_i32, %c0_i32_0 : i32, i32, i32
  }
  func.func @transform_2(%arg0: i32) -> (i32, i32) {
    %c0_i32 = arith.constant 0 : i32
    %c0_i32_0 = arith.constant 0 : i32
    %c0_i32_1 = arith.constant 0 : i32
    return %c0_i32, %c0_i32_0 : i32, i32
  }
  func.func @transform_3(%arg0: i32) -> (i32, i32) {
    %c0_i32 = arith.constant 0 : i32
    %c0_i32_0 = arith.constant 0 : i32
    %c0_i32_1 = arith.constant 0 : i32
    return %c0_i32, %c0_i32_0 : i32, i32
  }
  func.func @transform_4(%arg0: i32) -> (i32, i32) {
    %c0_i32 = arith.constant 0 : i32
    %c0_i32_0 = arith.constant 0 : i32
    %c0_i32_1 = arith.constant 0 : i32
    return %c0_i32, %c0_i32_0 : i32, i32
  }
  func.func @transform_5(%arg0: i32) -> (i32, i32) {
    %c0_i32 = arith.constant 0 : i32
    %c0_i32_0 = arith.constant 0 : i32
    %c0_i32_1 = arith.constant 0 : i32
    return %c0_i32, %c0_i32_0 : i32, i32
  }
  func.func @transform_6(%arg0: i32) -> (i32, i32, i32) {
    %c0_i32 = arith.constant 0 : i32
    %c0_i32_0 = arith.constant 0 : i32
    %c0_i32_1 = arith.constant 0 : i32
    return %arg0, %c0_i32, %c0_i32_0 : i32, i32, i32
  }
}

</mosaic_0001>

<bundles_post_ra>
// kernel: tpu_custom_call.1
= control target key start
LH: loop header
LB: loop body
LE: loop exit
PB: predicated region body
PF: predicated region fallthrough
CT: control target
= control target key end

     0   :  { %s2527_s0 = inlined_call_operand.hbm [shape: f32[2,8,32], index: 0, kind: input, shape index: {}]   ;;  %s2528_s1 = inlined_call_operand.hbm [shape: f32[2,8,32], index: 1, kind: input, shape index: {}]   ;;  %s2529_s2 = inlined_call_operand.hbm [shape: f32[32,32], index: 2, kind: input, shape index: {}]   ;;  %s2530_s3 = inlined_call_operand.hbm [shape: f32[32,32], index: 3, kind: input, shape index: {}]   ;;  %s2531_s4 = inlined_call_operand.hbm [shape: f32[32,32], index: 4, kind: input, shape index: {}]   ;;  %s2532_s5 = inlined_call_operand.hbm [shape: f32[32,32], index: 5, kind: input, shape index: {}]   ;;  %s2533_s6 = inlined_call_operand.hbm [shape: f32[2,8,32], index: 6, kind: output, shape index: {}]  }
   0x1   :  { %2538 = sst [smem:[#allocation20_spill]] %s2529_s2 }
   0x2   :  { %2539 = sst [smem:[#allocation21_spill]] %s2530_s3 }
   0x3   :  { %2540 = sst [smem:[#allocation22_spill]] %s2531_s4 }
   0x4   :  { %11 = vsyncpa [#allocation3], 0 }
   0x5   :  { %13 = vsyncpa [#allocation3 + $0x1], 0 }
   0x6   :  { %14 = vsyncpa [#allocation6], 0 }
   0x7   :  { %16 = vsyncpa [#allocation6 + $0x1], 0 }
   0x8   :  { %17 = vsyncpa [#allocation9], 0 }
   0x9   :  { %18 = vsyncpa [#allocation12], 0 }
   0xa   :  { %19 = vsyncpa [#allocation4], 0 }
   0xb   :  { %21 = vsyncpa [#allocation4 + $0x1], 0  ;;  %s2102_s21 = smov 0   ;;  %s2104_s22 = smov 0  }
   0xc   :  { %s2106_s23 = smov 0   ;;  %s2108_s24 = smov 0  }
   0xd LB: > { %s2049_s25 = smov [#allocation7]   ;;  %s2123_s27 = sadd.s32 4294967295, %s2047_s24   ;;  %s2047_s24 = sphi %s2108_s24, %s2567_s24   ;;  %s2043_s23 = sphi %s2106_s23, %s2566_s23   ;;  %s2039_s22 = sphi %s2104_s22, %s2565_s22   ;;  %s2035_s21 = sphi %s2102_s21, %s2564_s21  }
   0xe   : > { %s206_s26 = sshll.u32 %s2049_s25, 4  ;;  %p1492_p0 = scmp.ge.s32.totalorder %s2047_s24, 1  ;;  %s2128_s26 = int_to_ptr.vmem [resolvable:$true] %s206_s26 }
   0xf   : > { %p2534_p1 = scmp.eq.s32.totalorder %s2123_s27, 0  ;;  %p194_p2 = scmp.lt.s32.totalorder %s2047_s24, 3 }
  0x10   : > { %s2050_s29 = smov [#allocation8]   ;;  %s2051_s8 = smov [#allocation10]  }
  0x11   : > { %p2130_p3 = pnand %p1492_p0, %p194_p2  ;;  %s219_s30 = sshll.u32 %s2050_s29, 4  ;;  %s2143_s30 = int_to_ptr.vmem [resolvable:$true] %s219_s30 }
  0x12   : > { %s232_s9 = sshll.u32 %s2051_s8, 4  ;;  %s2543_s2 = sld [smem:[#allocation20_spill]]  ;;  %s2145_s9 = int_to_ptr.vmem [resolvable:$true] %s232_s9 }
  0x13   : > { %s2541_s28 = scalar_select %p2130_p3, 1, 0 }
  0x14   : > { %p1696_p5 = pneg %p2130_p3 }
  0x16   : > { %p2139_p6 = pnand %p1696_p5, %p2534_p1 }
  0x18   : > { %s1793_s12 = scalar_lea.hbm %s2543_s2, 512  ;;  %p2155_p8 = pneg %p2139_p6 }
  0x19   : > { %p1794_p7 = scmp.ne.s32.totalorder %s2543_s2, %s1793_s12  ;;  %p1800_p11 = scmp.lt.u32.totalorder %s1793_s12, %s2543_s2 }
  0x1b   : > { %p1796_p9 = pnand %p2155_p8, %p1794_p7 }
  0x1d   : > { %p1797_p10 = pneg %p1796_p9 }
  0x1f   : > { %p1802_p12 = pnand %p1800_p11, %p1797_p10 }
  0x21   : > { %1805 = shalt.err (!%p1802_p12)
}
  0x22   : > { %s1806_s18 = scalar_lea.vmem %s2128_s26, 512  ;;  %p1814_p5 = scmp.lt.s32.totalorder %s2128_s26, %s2128_s26 }
  0x23   : > { %p1807_p13 = scmp.ne.s32.totalorder %s2128_s26, %s1806_s18  ;;  %p1815_p4 = scmp.lt.s32.totalorder %s1806_s18, %s1806_s18 }
  0x25   : > { %p1809_p0 = pnand %p1807_p13, %p2155_p8  ;;  %p1816_p7 = por %p1815_p4, %p1814_p5 }
  0x27   : > { %p1810_p2 = pneg %p1809_p0 }
  0x29   : > { %p1817_p9 = pnand %p1816_p7, %p1810_p2 }
  0x2b   : > { %1820 = shalt.err (!%p1817_p9)
}
  0x2c   : > { %s2052_s19 = smov 128   ;;  %s2053_s20 = smov 8  }
  0x2d   : > { %1699 = dma.hbm_to_vmem [thread:$0]  (!%p2139_p6), %s2543_s2, 512, %s2128_s26, [#allocation6], %s2052_s19, %s2052_s19, %s2053_s20  }
  0x2e   : > { %s2545_s3 = sld [smem:[#allocation21_spill]] }
  0x34   : > { %s1821_s11 = scalar_lea.hbm %s2545_s3, 512 }
  0x35   : > { %p1822_p4 = scmp.ne.s32.totalorder %s2545_s3, %s1821_s11  ;;  %p1828_p12 = scmp.lt.u32.totalorder %s1821_s11, %s2545_s3 }
  0x37   : > { %p1824_p10 = pnand %p1822_p4, %p2155_p8 }
  0x39   : > { %p1825_p11 = pneg %p1824_p10 }
  0x3b   : > { %p1830_p13 = pnand %p1828_p12, %p1825_p11 }
  0x3d   : > { %1833 = shalt.err (!%p1830_p13)
}
  0x3e   : > { %s1834_s26 = scalar_lea.vmem %s2143_s30, 512  ;;  %p1842_p7 = scmp.lt.s32.totalorder %s2143_s30, %s2143_s30 }
  0x3f   : > { %p1835_p0 = scmp.ne.s32.totalorder %s2143_s30, %s1834_s26  ;;  %p1843_p9 = scmp.lt.s32.totalorder %s1834_s26, %s1834_s26 }
  0x41   : > { %p1837_p2 = pnand %p1835_p0, %p2155_p8  ;;  %p1844_p4 = por %p1843_p9, %p1842_p7 }
  0x43   : > { %p1838_p5 = pneg %p1837_p2 }
  0x45   : > { %p1845_p10 = pnand %p1844_p4, %p1838_p5 }
  0x47   : > { %1848 = shalt.err (!%p1845_p10)
}
  0x48   : > { %1702 = dma.hbm_to_vmem [thread:$0]  (!%p2139_p6), %s2545_s3, 512, %s2143_s30, [#allocation9], %s2052_s19, %s2052_s19, %s2053_s20  }
  0x49   : > { %s2546_s4 = sld [smem:[#allocation22_spill]] }
  0x4f   : > { %s1849_s8 = scalar_lea.hbm %s2546_s4, 512 }
  0x50   : > { %p1850_p11 = scmp.ne.s32.totalorder %s2546_s4, %s1849_s8  ;;  %p1856_p0 = scmp.lt.u32.totalorder %s1849_s8, %s2546_s4 }
  0x52   : > { %p1852_p12 = pnand %p1850_p11, %p2155_p8 }
  0x54   : > { %p1853_p13 = pneg %p1852_p12 }
  0x56   : > { %p1858_p2 = pnand %p1856_p0, %p1853_p13 }
  0x58   : > { %1861 = shalt.err (!%p1858_p2)
}
  0x59   : > { %s1862_s30 = scalar_lea.vmem %s2145_s9, 512  ;;  %p1870_p4 = scmp.lt.s32.totalorder %s2145_s9, %s2145_s9 }
  0x5a   : > { %p1863_p5 = scmp.ne.s32.totalorder %s2145_s9, %s1862_s30  ;;  %p1871_p10 = scmp.lt.s32.totalorder %s1862_s30, %s1862_s30 }
  0x5c   : > { %p1865_p7 = pnand %p1863_p5, %p2155_p8  ;;  %p1872_p11 = por %p1871_p10, %p1870_p4 }
  0x5e   : > { %p1866_p9 = pneg %p1865_p7 }
  0x60   : > { %p1873_p12 = pnand %p1872_p11, %p1866_p9 }
  0x62   : > { %1876 = shalt.err (!%p1873_p12)
}
  0x63   : > { %1705 = dma.hbm_to_vmem [thread:$0]  (!%p2139_p6), %s2546_s4, 512, %s2145_s9, [#allocation9], %s2052_s19, %s2052_s19, %s2053_s20  }
  0x64   : > { %s2054_s26 = smov [#allocation11]   ;;  %s1877_s29 = scalar_lea.hbm %s2532_s5, 512 }
  0x65   : > { %s245_s17 = sshll.u32 %s2054_s26, 4  ;;  %p1878_p13 = scmp.ne.s32.totalorder %s2532_s5, %s1877_s29  ;;  %s246_s17 = int_to_ptr.vmem [resolvable:$true] %s245_s17 }
  0x66   : > { %p1884_p5 = scmp.lt.u32.totalorder %s1877_s29, %s2532_s5 }
  0x67   : > { %p1880_p0 = pnand %p1878_p13, %p2155_p8 }
  0x69   : > { %p1881_p2 = pneg %p1880_p0 }
  0x6b   : > { %p1886_p7 = pnand %p1884_p5, %p1881_p2 }
  0x6d   : > { %1889 = shalt.err (!%p1886_p7)
}
  0x6e   : > { %s1890_s9 = scalar_lea.vmem %s246_s17, 512  ;;  %p1898_p11 = scmp.lt.s32.totalorder %s246_s17, %s246_s17 }
  0x6f   : > { %p1891_p9 = scmp.ne.s32.totalorder %s246_s17, %s1890_s9  ;;  %p1899_p12 = scmp.lt.s32.totalorder %s1890_s9, %s1890_s9 }
  0x71   : > { %p1893_p4 = pnand %p1891_p9, %p2155_p8  ;;  %p1900_p1 = por %p1899_p12, %p1898_p11 }
  0x73   : > { %p1894_p10 = pneg %p1893_p4 }
  0x75   : > { %p1901_p3 = pnand %p1900_p1, %p1894_p10 }
  0x77   : > { %1904 = shalt.err (!%p1901_p3)
}
  0x78   : > { %1708 = dma.hbm_to_vmem [thread:$0]  (!%p2139_p6), %s2532_s5, 512, %s246_s17, [#allocation12], %s2052_s19, %s2052_s19, %s2053_s20  }
  0x79   : > { %s1491_s7 = sadd.s32 4294967294, %s2047_s24   ;;  %s2254_s15 = sadd.s32 1, %s2047_s24  }
  0x7a   : > { %s31_s14 = ssub.s32 %s2047_s24, %s2254_s15  ;;  %s34_s16 = sadd.s32 1, %s2043_s23 }
  0x7b   : > { %p32_p1 = scmp.eq.s32.totalorder %s31_s14, 0  ;;  %p41_p3 = scmp.ne.s32.totalorder %s2043_s23, %s2039_s22 }
  0x7c   : > { %p42_p8 = scmp.eq.s32.totalorder %s2047_s24, 0  ;;  %p47_p13 = scmp.ne.s32.totalorder %s2039_s22, %s2035_s21 }
  0x7d   : > { %s2265_s26 = scalar_select %p32_p1, %s2043_s23, %s34_s16  }
  0x7e   : > { %p2267_p0 = por %p42_p8, %p41_p3  ;;  %p2548_p2 = scmp.eq.s32.totalorder %s2123_s27, 0 }
  0x7f   : > { %p181_p5 = scmp.eq.s32.totalorder %s2123_s27, 1  ;;  %p187_p7 = scmp.eq.s32.totalorder %s1491_s7, 1 }
  0x80   : > { %p2273_p6 = por %p2548_p2, %p47_p13  ;;  %p1724_p9 = scmp.lt.s32.totalorder %s2047_s24, 2 }
  0x81   : > { %s259_s20 = sand.u32 1, %s2043_s23   ;;  %p2280_p4 = por %p181_p5, %p41_p3 }
  0x82   : > { %s2549_s19 = scalar_select %p2273_p6, 1, 0 }
  0x83   : > { %s2550_s17 = scalar_select %p2280_p4, 1, 0 }
  0x84   : > { %p2284_p10 = por %p187_p7, %p47_p13  ;;  %s2288_s29 = sshll.u32 %s259_s20, 3 }
  0x85   : > { %s1499_s8 = sshll.u32 %s2047_s24, 7  ;;  %s263_s9 = scalar_lea.vmem [#allocation2], %s2288_s29 }
  0x86   : > { %s2551_s25 = scalar_select %p2284_p10, 1, 0 }
  0x87   : > { %s2294_s12 = scalar_lea.hbm %s2527_s0, %s1499_s8  ;;  %s270_s13 = sshll.u32 %s263_s9, 4  ;;  %s2297_s13 = int_to_ptr.vmem [resolvable:$true] %s270_s13 }
  0x88   : > { %p2301_p11 = pnand %p1724_p9, %p2267_p0  ;;  %s2308_s16 = scalar_lea.hbm %s2528_s1, %s1499_s8 }
  0x89   : > { %s277_s10 = sand.u32 1, %s2047_s24   ;;  %s260_s11 = scalar_lea.sflag [#allocation3], %s259_s20 }
  0x8a   : > { %s1905_s2 = scalar_lea.hbm %s2294_s12, 128  ;;  %p1907_p1 = pneg %p2301_p11 }
  0x8b   : > { %p1906_p12 = scmp.ne.s32.totalorder %s2294_s12, %s1905_s2  ;;  %s1910_s3 = scalar_lea.hbm %s2527_s0, 256 }
  0x8c   : > { %p1911_p13 = scmp.lt.u32.totalorder %s2294_s12, %s2527_s0  ;;  %p1912_p0 = scmp.lt.u32.totalorder %s1910_s3, %s1905_s2 }
  0x8d   : > { %p1908_p3 = pnand %p1907_p1, %p1906_p12  ;;  %p1914_p5 = scmp.lt.u32.totalorder %s1905_s2, %s2294_s12 }
  0x8e   : > { %p1913_p2 = por %p1912_p0, %p1911_p13 }
  0x8f   : > { %p1909_p8 = pneg %p1908_p3 }
  0x90   : > { %p1915_p7 = por %p1914_p5, %p1913_p2 }
  0x92   : > { %p1916_p9 = pnand %p1915_p7, %p1909_p8 }
  0x94   : > { %1919 = shalt.err (!%p1916_p9)
}
  0x95   : > { %s1920_s20 = scalar_lea.vmem %s2297_s13, 128  ;;  %s2055_s8 = smov [#allocation2]  }
  0x96   : > { %p1921_p12 = scmp.ne.s32.totalorder %s2297_s13, %s1920_s20  ;;  %s1925_s14 = sshll.u32 %s2055_s8, 4  ;;  %s1926_s14 = int_to_ptr.vmem [resolvable:$false] %s1925_s14 }
  0x97   : > { %s1927_s4 = scalar_lea.vmem %s1926_s14, 256  ;;  %p1928_p4 = scmp.lt.s32.totalorder %s2297_s13, %s1926_s14 }
  0x98   : > { %p1923_p3 = pnand %p1921_p12, %p1907_p1  ;;  %p1929_p13 = scmp.lt.s32.totalorder %s1927_s4, %s1920_s20 }
  0x9a   : > { %p1924_p10 = pneg %p1923_p3  ;;  %p1930_p0 = por %p1929_p13, %p1928_p4 }
  0x9c   : > { %p1931_p2 = pnand %p1930_p0, %p1924_p10 }
  0x9e   : > { %1934 = shalt.err (!%p1931_p2)
}
  0x9f   : > { %1712 = dma.hbm_to_vmem [thread:$0]  (!%p2301_p11), %s2294_s12, 128, %s2297_s13, %s260_s11  }
  0xa0   : > { %s281_s2 = scalar_lea.vmem [#allocation5], %s2288_s29  ;;  %s278_s18 = scalar_lea.sflag [#allocation6], %s277_s10 }
  0xa1   : > { %s288_s3 = sshll.u32 %s281_s2, 4  ;;  %s1935_s9 = scalar_lea.hbm %s2308_s16, 128  ;;  %s289_s3 = int_to_ptr.vmem [resolvable:$true] %s288_s3 }
  0xa2   : > { %p1936_p4 = scmp.ne.s32.totalorder %s2308_s16, %s1935_s9  ;;  %s1940_s8 = scalar_lea.hbm %s2528_s1, 256 }
  0xa3   : > { %p1941_p5 = scmp.lt.u32.totalorder %s2308_s16, %s2528_s1  ;;  %p1942_p7 = scmp.lt.u32.totalorder %s1940_s8, %s1935_s9 }
  0xa4   : > { %p1938_p10 = pnand %p1936_p4, %p1907_p1  ;;  %p1944_p12 = scmp.lt.u32.totalorder %s1935_s9, %s2308_s16 }
  0xa5   : > { %p1943_p9 = por %p1942_p7, %p1941_p5 }
  0xa6   : > { %p1939_p8 = pneg %p1938_p10 }
  0xa7   : > { %p1945_p3 = por %p1944_p12, %p1943_p9 }
  0xa9   : > { %p1946_p13 = pnand %p1945_p3, %p1939_p8 }
  0xab   : > { %1949 = shalt.err (!%p1946_p13)
}
  0xac   : > { %s1950_s29 = scalar_lea.vmem %s289_s3, 128  ;;  %s2056_s12 = smov [#allocation5]  }
  0xad   : > { %p1951_p0 = scmp.ne.s32.totalorder %s289_s3, %s1950_s29  ;;  %s1955_s13 = sshll.u32 %s2056_s12, 4  ;;  %s1956_s13 = int_to_ptr.vmem [resolvable:$false] %s1955_s13 }
  0xae   : > { %s1957_s10 = scalar_lea.vmem %s1956_s13, 256  ;;  %p1958_p10 = scmp.lt.s32.totalorder %s289_s3, %s1956_s13 }
  0xaf   : > { %p1953_p2 = pnand %p1951_p0, %p1907_p1  ;;  %p1959_p6 = scmp.lt.s32.totalorder %s1957_s10, %s1950_s29 }
  0xb1   : > { %p1954_p4 = pneg %p1953_p2  ;;  %p1960_p5 = por %p1959_p6, %p1958_p10 }
  0xb3   : > { %p1961_p7 = pnand %p1960_p5, %p1954_p4 }
  0xb5   : > { %1964 = shalt.err (!%p1961_p7)
}
  0xb6   : > { %1715 = dma.hbm_to_vmem [thread:$0]  (!%p2301_p11), %s2308_s16, 128, %s289_s3, %s278_s18  }
  0xb7   : > { %p2553_p8 = scmp.ne.s32.totalorder %s2541_s28, 0 }
  0xb8   : > { %s2361_s11 = sand.u32 (!%p2553_p8), 1, %s2039_s22   ;;  %p2554_p6 = scmp.ne.s32.totalorder (!%p2553_p8), %s2549_s19, 0 }
  0xb9   : > { %297 = sbr.rel (%p2553_p8) target bundleno = 2107 (0x83b), region = 44  ;;  %s2364_s2 = sshll.u32 (!%p2553_p8), %s2361_s11, 3 }
  0xba   : > { %s300_s9 = scalar_lea.sflag (!%p2553_p8), [#allocation3], %s2361_s11  ;;  %s303_s7 = scalar_lea.vmem (!%p2553_p8), [#allocation2], %s2364_s2 }
  0xc0   : > { %2010 = dma.done.wait (%p2554_p6), %s300_s9, 128  }
  0xc1   : > { %2012 = vsyncadd (%p2554_p6), %s300_s9, 4294967168  ;;  %s308_s28 = sand.u32 1, %s2123_s27   ;;  %s312_s16 = scalar_lea.vmem [#allocation5], %s2364_s2 }
  0xc2   : > { %s309_s30 = scalar_lea.sflag [#allocation6], %s308_s28 }
  0xc3   : > { %2014 = dma.done.wait (%p2554_p6), %s309_s30, 128  }
  0xc4   : > { %2016 = vsyncadd (%p2554_p6), %s309_s30, 4294967168  ;;  %p2555_p11 = scmp.eq.s32.totalorder %s2123_s27, 0 }
  0xc6   : > { %2018 = dma.done.wait (%p2555_p11), [#allocation6], 512   ;;  %p2556_p1 = pmov %p2555_p11 }
  0xc8   : > { %2020 = vsyncadd (%p2556_p1), [#allocation6], 4294966784  ;;  %p2557_p9 = pmov %p2556_p1 }
  0xc9   : > { %p2558_p12 = pmov %p2556_p1 }
  0xca   : > { %2022 = dma.done.wait (%p2557_p9), [#allocation9], 1024  }
  0xcb   : > { %2024 = vsyncadd (%p2558_p12), [#allocation9], 4294966272  ;;  %p2559_p3 = pmov %p2556_p1 }
  0xcc   : > { %p2560_p13 = pmov %p2556_p1 }
  0xcd   : > { %2026 = dma.done.wait (%p2559_p3), [#allocation12], 512  }
  0xce   : > { %2028 = vsyncadd (%p2560_p13), [#allocation12], 4294966784  ;;  %v2057_v0 = vmov 0.0|0.0   ;;  %vm2058_vm0 = vmmov 0   ;;  %v2059_v1 = vmov 0.0   ;;  %v443_v2 = vld [vmem:[#allocation8] sm:$0xff] }
  0xcf   : > { %1656 = vmatprep.subr.bf16.mxu1 %v2057_v0  ;;  %1650 = vmatprep.subr.bf16.mxu0 %v2057_v0  ;;  %v444_v3 = vld [vmem:[#allocation8 + $0x8] sm:$0xff]  ;;  %v364_v4 = vld [vmem:[#allocation7] sm:$0xff]  ;;  %v445_v7 = vld [vmem:[#allocation8 + $0x10] sm:$0xff]  ;;  %vm368_vm1 = vcmask 261120   ;;  %vm594_vm2 = vcmask 64512   ;;  %s2060_s19 = smov 120  }
  0xd0   : > { %1585 = vmatprep.mubr.msk.f32.mxu1 %vm2058_vm0, %v2059_v1  ;;  %1574 = vmatprep.mubr.msk.f32.mxu0 %vm2058_vm0, %v2059_v1  ;;  %v1657_v5 = vpack.c.bf16 %v444_v3, %v443_v2  ;;  %v365_v6 = vld [vmem:[#allocation7 + $0x8] sm:$0xff]  ;;  %v446_v8 = vld [vmem:[#allocation8 + $0x18] sm:$0xff]  ;;  %v366_v10 = vld [vmem:[#allocation7 + $0x10] sm:$0xff]  ;;  %s2061_s3 = smov 112   ;;  %s2062_s18 = smov 104   ;;  %vm1264_vm3 = vcmask 130048  }
  0xd1   : > { %v1651_v9 = vpack.c.bf16 %v365_v6, %v364_v4  ;;  %v367_v11 = vld [vmem:[#allocation7 + $0x18] sm:$0xff]  ;;  %v1660_v12 = vpack.c.bf16 %v446_v8, %v445_v7  ;;  %v362_v15 = vld [vmem:[%s303_s7] sm:$0xff]  ;;  %v522_v23 = vld [vmem:[#allocation10 + $0x10] sm:$0xff]  ;;  %s2063_s20 = smov 8   ;;  %s2064_s8 = smov 16   ;;  %vm1266_vm4 = vcmask 195584  }
  0xd2   : > { %1658 = vmatpush3.bf16.msra.mxu1 %v1657_v5  ;;  %v1654_v13 = vpack.c.bf16 %v367_v11, %v366_v10  ;;  %v363_v14 = vld [vmem:[%s312_s16] sm:$0xff]  ;;  %v520_v21 = vld [vmem:[#allocation10] sm:$0xff]  ;;  %v521_v22 = vld [vmem:[#allocation10 + $0x8] sm:$0xff]  ;;  %s2065_s14 = smov 24   ;;  %s1527_s4 = sshll.u32 %s2123_s27, 7 }
  0xd3   : > { %1652 = vmatpush3.bf16.msra.mxu0 %v1651_v9  ;;  %1659 = vmatprep.subr.bf16.mxu1 %v2057_v0  ;;  %v1663_v24 = vpack.c.bf16 %v521_v22, %v520_v21  ;;  %v523_v25 = vld [vmem:[#allocation10 + $0x18] sm:$0xff]  ;;  %v1268_v22 = vld [vmem:[#allocation11] sm:$0xff]  ;;  %s361_s29 = scalar_lea.vmem [#allocation13], %s2364_s2  ;;  %s2482_s9 = scalar_lea.hbm %s2533_s6, %s1527_s4 }
  0xd4   : > { %1653 = vmatprep.subr.bf16.mxu0 %v2057_v0  ;;  %v1666_v26 = vpack.c.bf16 %v523_v25, %v522_v23  ;;  %v1269_v23 = vld [vmem:[#allocation11 + $0x8] sm:$0xff]  ;;  %v1270_v25 = vld [vmem:[#allocation11 + $0x10] sm:$0xff]  ;;  %s1360_s12 = sshll.u32 %s361_s29, 4  ;;  %s1347_s7 = scalar_lea.sflag [#allocation4], %s2361_s11  ;;  %s2484_s12 = int_to_ptr.vmem [resolvable:$true] %s1360_s12 }
  0xd5   : > { %s1965_s28 = scalar_lea.vmem %s2484_s12, 128  ;;  %p2561_p2 = scmp.ne.s32.totalorder %s2550_s17, 0 }
  0xd6   : > { %1661 = vmatpush3.bf16.msra.mxu1 %v1660_v12  ;;  %p1966_p0 = scmp.ne.s32.totalorder %s2484_s12, %s1965_s28  ;;  %s2066_s27 = smov [#allocation13]  }
  0xd7   : > { %1655 = vmatpush3.bf16.msra.mxu0 %v1654_v13  ;;  %1599 = vmatprep.subr.mxu1 %v2059_v1  ;;  %s1969_s2 = sshll.u32 %s2066_s27, 4  ;;  %s1970_s2 = int_to_ptr.vmem [resolvable:$false] %s1969_s2 }
  0xd8   : > { %1662 = vmatprep.subr.bf16.mxu0 %v2057_v0  ;;  %p1967_p4 = pnand %p1966_p0, %p2561_p2  ;;  %s1971_s30 = scalar_lea.vmem %s1970_s2, 256 }
  0xd9   : > { %1586 = vmatmul.mubr.msk.f32.vlgmr.msra.gmra.mrb[0].mxu1 %vm368_vm1, %v363_v14  ;;  %p1972_p5 = scmp.lt.s32.totalorder %s2484_s12, %s1970_s2  ;;  %p1973_p7 = scmp.lt.s32.totalorder %s1971_s30, %s1965_s28 }
  0xda   : > { %1575 = vmatmul.mubr.msk.f32.vlgmr.msra.gmra.mrb[0].mxu0 %vm368_vm1, %v362_v15  ;;  %1601 = vmatprep.mubr.msk.f32.mxu1 %vm2058_vm0, %v2059_v1  ;;  %p1968_p10 = pneg %p1967_p4 }
  0xdb   : > { %1596 = vmatprep.mubr.msk.f32.mxu0 %vm2058_vm0, %v2059_v1  ;;  %1664 = vmatpush3.bf16.msra.mxu0 %v1663_v24  ;;  %v1669_v24 = vpack.c.bf16 %v1269_v23, %v1268_v22  ;;  %p1974_p8 = por %p1973_p7, %p1972_p5 }
  0xdc   : > { %1665 = vmatprep.subr.bf16.mxu0 %v2057_v0 }
  0xdd   : > { %p1975_p6 = pnand %p1974_p8, %p1968_p10 }
  0xdf   : > { %1667 = vmatpush3.bf16.msra.mxu0 %v1666_v26  ;;  %v1271_v26 = vld [vmem:[#allocation11 + $0x18] sm:$0xff] }
  0xe0   : > { %1619 = vmatprep.subr.mxu0 %v2059_v1 }
  0xe2   : > { %1597 = vmatmul.mubr.msk.f32.vlgmr.msra.gmra.mrb[2].mxu0 %vm368_vm1, %v363_v14 }
  0xe3   : > { %1621 = vmatprep.mubr.msk.f32.mxu0 %vm2058_vm0, %v2059_v1 }
 0x1ac   : > { %v516_v16 = vpop.f32.mrb[0].mxu1 }
 0x1ad   : > { %757 = vrot.lane.b32.xlu1 %v516_v16, %s2060_s19  ;;  %v438_v17 = vpop.f32.mrb[0].mxu0  ;;  %v1587_v18 = vpop.f32.mrb[1].mxu1  ;;  %1600 = vmatpush3.xpose.msk.msra.mxu1 %vm594_vm2, %v516_v16 }
 0x1ae   : > { %v442_v19 = vmul.f32 0.35355338, %v438_v17  ;;  %v1576_v20 = vpop.f32.mrb[1].mxu0  ;;  %1604 = vmatprep.subr.mxu1 %v2059_v1 }
 0x1b0   : > { %1602 = vmatmul.mubr.msk.f32.vlgmr.msra.gmra.mrb[2].mxu1 %vm594_vm2, %v442_v19 }
 0x1b1   : > { %755 = vrot.lane.b32.xlu1 %v442_v19, %s2060_s19  ;;  %1606 = vmatprep.mubr.msk.f32.mxu1 %vm2058_vm0, %v2059_v1 }
 0x1b5   : > { %921 = vrot.lane.b32.xlu1 %v442_v19, %s2061_s3  ;;  %v2427_v35 = vpop.f32.mrb[2].mxu0 }
 0x1b6   : > { %v1598_v36 = vpop.f32.mrb[3].mxu0  ;;  %1605 = vmatpush3.msra.mxu1 %v2427_v35 }
 0x1b7   : > { %1609 = vmatprep.subr.mxu1 %v2059_v1 }
 0x1b9   : > { %1088 = vrot.lane.b32.xlu1 %v516_v16, %s2062_s18 }
 0x1bd   : > { %1086 = vrot.lane.b32.xlu1 %v442_v19, %s2062_s18 }
 0x21f   : > { %v758_v37 = vpop.permute.xlu1 %757 }
 0x223   : > { %v756_v38 = vpop.permute.xlu1 %755 }
 0x227   : > { %v922_v39 = vpop.permute.xlu1 %921 }
 0x22b   : > { %v1089_v42 = vpop.permute.xlu1 %1088 }
 0x22f   : > { %v1087_v44 = vpop.permute.xlu1 %1086 }
 0x283   : > { %v667_v27 = vpop.f32.mrb[2].mxu1 }
 0x284   : > { %v1603_v28 = vpop.f32.mrb[3].mxu1  ;;  %v671_v29 = vsel %vm594_vm2, %v667_v27, -inf }
 0x285   : > { %672 = vmax.xlane.f32.xlu0 %v671_v29 }
 0x312   : > { %v673_v30 = vpop.xlane.xlu0 %672 }
 0x313   : > { %v674_v31 = vsub.f32 %v667_v27, %v673_v30  ;;  %v1672_v27 = vpack.c.bf16 %v1271_v26, %v1270_v25 }
 0x315   : > { %v675_v32 = vmul.f32 1.442695, %v674_v31 }
 0x317   : > { %1777 = vpow2.f32 %v675_v32 }
 0x321   : > { %v1778_v33 = vpop.eup %1777 }
 0x322   : > { %v677_v34 = vsel %vm594_vm2, %v1778_v33, 0.0 }
 0x323   : > { %678 = vadd.xlane.f32.xlu0 %v677_v34 }
 0x339   : > { %923 = vrot.lane.b32.xlu0 %v516_v16, %s2061_s3 }
 0x3b0   : > { %v679_v40 = vpop.xlane.xlu0 %678 }
 0x3b1   : > { %1779 = vrcp.f32 %v679_v40 }
 0x3b4   : > { %v924_v41 = vpop.permute.xlu0 %923 }
 0x3b5   : > { %1620 = vmatpush3.xpose.msk.msra.mxu0 %vm594_vm2, %v924_v41 }
 0x3b6   : > { %1629 = vmatprep.subr.mxu0 %v2059_v1 }
 0x3b8   : > { %1622 = vmatmul.mubr.msk.f32.vlgmr.msra.gmra.mrb[4].mxu0 %vm594_vm2, %v922_v39 }
 0x3b9   : > { %1630 = vmatpush3.xpose.msk.msra.mxu0 %vm594_vm2, %v1089_v42  ;;  %1631 = vmatprep.mubr.msk.f32.mxu0 %vm2058_vm0, %v2059_v1 }
 0x3ba   : > { %1668 = vmatprep.subr.bf16.mxu0 %v2057_v0 }
 0x3bb   : > { %v1780_v43 = vpop.eup %1779 }
 0x3bc   : > { %v681_v45 = vmul.f32 %v1780_v43, %v1778_v33  ;;  %1632 = vmatmul.mubr.msk.f32.vlgmr.msra.gmra.mrb[6].mxu0 %vm594_vm2, %v1087_v44 }
 0x3bd   : > { %1647 = vmatprep.mubr.msk.f32.mxu0 %vm2058_vm0, %v2059_v1  ;;  %1670 = vmatpush3.bf16.msra.mxu0 %v1669_v24 }
 0x3be   : > { %1607 = vmatmul.mubr.msk.f32.vlgmr.msra.gmra.mrb[4].mxu1 %vm594_vm2, %v681_v45  ;;  %1671 = vmatprep.subr.bf16.mxu0 %v2057_v0 }
 0x3bf   : > { %1610 = vmatpush3.xpose.msk.msra.mxu1 %vm594_vm2, %v758_v37  ;;  %1611 = vmatprep.mubr.msk.f32.mxu1 %vm2058_vm0, %v2059_v1 }
 0x3c0   : > { %1614 = vmatprep.subr.mxu1 %v2059_v1 }
 0x3c1   : > { %1673 = vmatpush3.bf16.msra.mxu0 %v1672_v27 }
 0x3c2   : > { %1612 = vmatmul.mubr.msk.f32.vlgmr.msra.gmra.mrb[6].mxu1 %vm594_vm2, %v756_v38 }
 0x3c3   : > { %1616 = vmatprep.mubr.msk.f32.mxu1 %vm2058_vm0, %v2059_v1 }
 0x48b   : > { %v995_v46 = vpop.f32.mrb[4].mxu0 }
 0x48c   : > { %v1623_v47 = vpop.f32.mrb[5].mxu0  ;;  %v999_v48 = vsel %vm594_vm2, %v995_v46, -inf }
 0x48d   : > { %1000 = vmax.xlane.f32.xlu0 %v999_v48 }
 0x48f   : > { %v1160_v49 = vpop.f32.mrb[6].mxu0 }
 0x490   : > { %v1633_v50 = vpop.f32.mrb[7].mxu0  ;;  %v1164_v56 = vsel %vm594_vm2, %v1160_v49, -inf }
 0x491   : > { %v2451_v51 = vpop.f32.mrb[4].mxu1 }
 0x492   : > { %v1608_v52 = vpop.f32.mrb[5].mxu1 }
 0x495   : > { %v829_v53 = vpop.f32.mrb[6].mxu1 }
 0x496   : > { %v1613_v54 = vpop.f32.mrb[7].mxu1  ;;  %v833_v55 = vsel %vm594_vm2, %v829_v53, -inf }
 0x497   : > { %834 = vmax.xlane.f32.xlu1 %v833_v55 }
 0x49b   : > { %1165 = vmax.xlane.f32.xlu1 %v1164_v56 }
 0x51a   : > { %v1001_v57 = vpop.xlane.xlu0 %1000 }
 0x51b   : > { %v1002_v58 = vsub.f32 %v995_v46, %v1001_v57 }
 0x51d   : > { %v1003_v59 = vmul.f32 1.442695, %v1002_v58 }
 0x51f   : > { %1781 = vpow2.f32 %v1003_v59 }
 0x524   : > { %v835_v60 = vpop.xlane.xlu1 %834 }
 0x525   : > { %v836_v6 = vsub.f32 %v829_v53, %v835_v60 }
 0x527   : > { %v837_v7 = vmul.f32 1.442695, %v836_v6 }
 0x528   : > { %v1166_v61 = vpop.xlane.xlu1 %1165 }
 0x529   : > { %v1782_v62 = vpop.eup %1781  ;;  %v1167_v63 = vsub.f32 %v1160_v49, %v1166_v61 }
 0x52a   : > { %v1005_v2 = vsel %vm594_vm2, %v1782_v62, 0.0 }
 0x52b   : > { %v1168_v3 = vmul.f32 1.442695, %v1167_v63  ;;  %1006 = vadd.xlane.f32.xlu0 %v1005_v2 }
 0x52d   : > { %1783 = vpow2.f32 %v1168_v3 }
 0x52e   : > { %1785 = vpow2.f32 %v837_v7 }
 0x537   : > { %v1784_v4 = vpop.eup %1783 }
 0x538   : > { %v1170_v5 = vsel %vm594_vm2, %v1784_v4, 0.0  ;;  %v1786_v8 = vpop.eup %1785 }
 0x539   : > { %1171 = vadd.xlane.f32.xlu1 %v1170_v5  ;;  %v839_v9 = vsel %vm594_vm2, %v1786_v8, 0.0 }
 0x541   : > { %845 = vrot.lane.b32.xlu0 %v2427_v35, %s2060_s19 }
 0x54a   : > { %1010 = vrot.lane.b32.xlu1 %v2427_v35, %s2061_s3 }
 0x56e   : > { %840 = vadd.xlane.f32.xlu1 %v839_v9 }
 0x57f   : > { %1175 = vrot.lane.b32.xlu1 %v2427_v35, %s2062_s18 }
 0x5b8   : > { %v1007_v10 = vpop.xlane.xlu0 %1006 }
 0x5bc   : > { %v846_v11 = vpop.permute.xlu0 %845 }
 0x5bd   : > { %1615 = vmatpush3.msra.mxu1 %v846_v11 }
 0x5be   : > { %1624 = vmatprep.subr.mxu1 %v2059_v1 }
 0x5c6   : > { %v1172_v12 = vpop.xlane.xlu1 %1171 }
 0x5ca   : > { %v1011_v13 = vpop.permute.xlu1 %1010 }
 0x5fb   : > { %v841_v14 = vpop.xlane.xlu1 %840 }
 0x5fc   : > { %1787 = vrcp.f32 %v841_v14 }
 0x5fd   : > { %1789 = vrcp.f32 %v1007_v10 }
 0x5fe   : > { %1791 = vrcp.f32 %v1172_v12 }
 0x5ff   : > { %v1176_v20 = vpop.permute.xlu1 %1175 }
 0x606   : > { %v1788_v15 = vpop.eup %1787 }
 0x607   : > { %v843_v16 = vmul.f32 %v1788_v15, %v1786_v8  ;;  %v1790_v17 = vpop.eup %1789 }
 0x608   : > { %v1009_v18 = vmul.f32 %v1790_v17, %v1782_v62  ;;  %v1792_v19 = vpop.eup %1791 }
 0x609   : > { %1617 = vmatmul.mubr.msk.f32.vlgmr.msra.gmra.mrb[8].mxu1 %vm594_vm2, %v843_v16  ;;  %v1174_v21 = vmul.f32 %v1792_v19, %v1784_v4 }
 0x60a   : > { %1625 = vmatpush3.msra.mxu1 %v1011_v13  ;;  %1626 = vmatprep.mubr.msk.f32.mxu1 %vm2058_vm0, %v2059_v1 }
 0x60b   : > { %1634 = vmatprep.subr.mxu1 %v2059_v1 }
 0x60d   : > { %1627 = vmatmul.mubr.msk.f32.vlgmr.msra.gmra.mrb[10].mxu1 %vm594_vm2, %v1009_v18 }
 0x60e   : > { %1635 = vmatpush3.msra.mxu1 %v1176_v20  ;;  %1636 = vmatprep.mubr.msk.f32.mxu1 %vm2058_vm0, %v2059_v1 }
 0x611   : > { %1637 = vmatmul.mubr.msk.f32.vlgmr.msra.gmra.mrb[12].mxu1 %vm594_vm2, %v1174_v21 }
 0x6dc   : > { %v917_v28 = vpop.f32.mrb[8].mxu1 }
 0x6dd   : > { %1252 = vrot.lane.b32.xlu0 %v917_v28, %s2063_s20  ;;  %v1618_v29 = vpop.f32.mrb[9].mxu1 }
 0x6e0   : > { %v1082_v30 = vpop.f32.mrb[10].mxu1 }
 0x6e1   : > { %1256 = vrot.lane.b32.xlu1 %v1082_v30, %s2064_s8  ;;  %v1628_v1 = vpop.f32.mrb[11].mxu1 }
 0x6e4   : > { %v1247_v31 = vpop.f32.mrb[12].mxu1 }
 0x6e5   : > { %1260 = vrot.lane.b32.xlu0 %v1247_v31, %s2065_s14  ;;  %v1638_v32 = vpop.f32.mrb[13].mxu1 }
 0x74f   : > { %v1253_v33 = vpop.permute.xlu0 %1252 }
 0x750   : > { %v1263_v34 = vsel %vm594_vm2, %v2451_v51, %v1253_v33 }
 0x753   : > { %v1257_v0 = vpop.permute.xlu1 %1256 }
 0x754   : > { %v1265_v35 = vsel %vm1264_vm3, %v1263_v34, %v1257_v0 }
 0x757   : > { %v1261_v36 = vpop.permute.xlu0 %1260 }
 0x758   : > { %v1267_v37 = vsel %vm1266_vm4, %v1265_v35, %v1261_v36 }
 0x759   : > { %1648 = vmatmul.mubr.msk.f32.vlgmr.msra.gmra.mrb[8].mxu0 %vm368_vm1, %v1267_v37 }
 0x82c   : > { %v1341_v38 = vpop.f32.mrb[8].mxu0 }
 0x82d   : > { %1345 = vst.msk [vmem:[%s361_s29] sm:$0xff] %vm368_vm1, %v1341_v38  ;;  %v1649_v39 = vpop.f32.mrb[9].mxu0 }
 0x82e   : > { %1978 = shalt.err (!%p1975_p6)
}
 0x82f   : > { %s1979_s11 = scalar_lea.hbm %s2482_s9, 128  ;;  %s1983_s3 = scalar_lea.hbm %s2533_s6, 256 }
 0x830   : > { %p1980_p11 = scmp.ne.s32.totalorder %s2482_s9, %s1979_s11  ;;  %p1984_p12 = scmp.lt.u32.totalorder %s2482_s9, %s2533_s6 }
 0x831   : > { %p1985_p3 = scmp.lt.u32.totalorder %s1983_s3, %s1979_s11  ;;  %p1987_p0 = scmp.lt.u32.totalorder %s1979_s11, %s2482_s9 }
 0x832   : > { %p1981_p1 = pnand %p1980_p11, %p2561_p2 }
 0x833   : > { %p1986_p13 = por %p1985_p3, %p1984_p12 }
 0x834   : > { %p1982_p9 = pneg %p1981_p1 }
 0x835   : > { %p1988_p4 = por %p1987_p0, %p1986_p13 }
 0x837   : > { %p1989_p10 = pnand %p1988_p4, %p1982_p9 }
 0x839   : > { %1992 = shalt.err (!%p1989_p10)
}
 0x83a   : > { %1694 = dma.vmem_to_hbm [thread:$0]  (%p2561_p2), %s2484_s12, 128, %s2482_s9, %s1347_s7  }
 0x83b PF: > { %s1372_s8 = sand.u32 1, %s2035_s21   ;;  %p2562_p5 = scmp.ne.s32.totalorder %s2551_s25, 0 }
 0x83c   : > { %p2563_p7 = scmp.ge.s32.totalorder %s2047_s24, 2  ;;  %s1373_s14 = scalar_lea.sflag [#allocation4], %s1372_s8 }
 0x83e   : > { %p1717_p8 = pnand %p2563_p7, %p2562_p5 }
 0x840   : > { %2030 = dma.done.wait (!%p1717_p8), %s1373_s14, 128  }
 0x841   : > { %2032 = vsyncadd (!%p1717_p8), %s1373_s14, 4294967168  ;;  %p24_p6 = scmp.ge.s32.totalorder %s2254_s15, 4   ;;  %s2564_s21 = smov %s2039_s22 }
 0x842   : > { %s2565_s22 = smov %s2043_s23  ;;  %s2566_s23 = smov %s2265_s26 }
 0x843   : > { %s2567_s24 = smov %s2254_s15  ;;  %26 = sbr.rel (!%p24_p6) target bundleno = 13 (0xd), region = 118 }
 0x84a   :  { %1378 = vsyncpa [#allocation3], 1 }
 0x84b   :  { %1380 = vsyncpa [#allocation3 + $0x1], 1 }
 0x84c   :  { %1381 = vsyncpa [#allocation6], 1 }
 0x84d   :  { %1383 = vsyncpa [#allocation6 + $0x1], 1 }
 0x84e   :  { %1384 = vsyncpa [#allocation9], 1 }
 0x84f   :  { %1385 = vsyncpa [#allocation12], 1 }
 0x850   :  { %1386 = vsyncpa [#allocation4], 1 }
 0x851   :  { %1388 = vsyncpa [#allocation4 + $0x1], 1 }

</bundles_post_ra>
